<compile_context>
chip_gen: v5e
topology: v5e:2x2
jax: 0.10.0
libtpu: 0.0.40
codegen_flags: <defaults>
</compile_context>

<pallas_src>
import functools

import jax
import jax.numpy as jnp
from jax.experimental import pallas as pl
from jax.experimental.pallas import tpu as pltpu

H1 = 64          # logical hidden-1 width (PyTorch Linear(1, 64))
H2 = 128         # hidden-2 width
OUT = 4          # logical output width
H1_PAD = 128     # lane-dense padded hidden-1 width
OUT_PAD = 128    # lane-dense padded output width
DEFAULT_BLOCK_B = 512


def _round_up(n, m):
    return ((n + m - 1) // m) * m


def bridge_dqn_kernel(x_ref, w1_ref, b1_ref, w2_ref, b2_ref, w3_ref, b3_ref,
                      o_ref):
    # Layer 1: Linear(1, 128pad) + Tanh. K=1 contraction -> pure VPU
    # broadcast (outer product); no MXU push/drain for a 1-deep matmul.
    h1 = jnp.tanh(x_ref[...] * w1_ref[...] + b1_ref[...])
    # Layer 2: Linear(128pad, 128) + Tanh on the MXU, f32 accumulation.
    h2 = jnp.dot(h1, w2_ref[...], preferred_element_type=jnp.float32)
    h2 = jnp.tanh(h2 + b2_ref[...])
    # Layer 3: Linear(128, 128pad) -> lane-dense (TB, 128) store; the real
    # 4 outputs live in lanes [0:4], padding lanes are exactly zero.
    out = jnp.dot(h2, w3_ref[...], preferred_element_type=jnp.float32)
    o_ref[...] = (out + b3_ref[...]).astype(o_ref.dtype)


def _pad_params(p):
    """Zero-pad logical PyTorch-shaped params to lane-dense kernel shapes."""
    w1 = jnp.zeros((1, H1_PAD), jnp.float32).at[:, :H1].set(p["w1"])
    b1 = jnp.zeros((1, H1_PAD), jnp.float32).at[:, :H1].set(p["b1"])
    w2 = jnp.zeros((H1_PAD, H2), jnp.float32).at[:H1, :].set(p["w2"])
    b2 = p["b2"].reshape(1, H2).astype(jnp.float32)
    w3 = jnp.zeros((H2, OUT_PAD), jnp.float32).at[:, :OUT].set(p["w3"])
    b3 = jnp.zeros((1, OUT_PAD), jnp.float32).at[:, :OUT].set(p["b3"])
    return w1, b1, w2, b2, w3, b3


@functools.partial(jax.jit, static_argnames=("block_b",))
def bridge_dqn_forward(x, params, *, block_b=DEFAULT_BLOCK_B):
    """x: [B, 1] float32 -> [B, 4] float32 (matches BridgeDQN.forward)."""
    B = x.shape[0]
    # Batch maps to the sublane axis: keep tiles a multiple of 8 rows and pad
    # the batch so there is no masked remainder tile.
    tb = min(block_b, _round_up(max(B, 1), 8))
    bp = _round_up(B, tb)
    x = x.astype(jnp.float32)
    if bp != B:
        x = jnp.pad(x, ((0, bp - B), (0, 0)))

    w1, b1, w2, b2, w3, b3 = _pad_params(params)

    const2d = lambda shape: pl.BlockSpec(shape, lambda i: (0, 0))
    param_bytes = 4 * (w1.size + b1.size + w2.size + b2.size + w3.size + b3.size)
    cost = pl.CostEstimate(
        flops=2 * bp * (H1_PAD + H1_PAD * H2 + H2 * OUT_PAD),
        transcendentals=bp * (H1_PAD + H2),
        bytes_accessed=4 * bp * (1 + OUT_PAD) + param_bytes,
    )

    out = pl.pallas_call(
        bridge_dqn_kernel,
        out_shape=jax.ShapeDtypeStruct((bp, OUT_PAD), jnp.float32),
        grid=(bp // tb,),
        in_specs=[
            pl.BlockSpec((tb, 1), lambda i: (i, 0)),      # x: batch-tiled
            const2d(w1.shape), const2d(b1.shape),          # weights resident
            const2d(w2.shape), const2d(b2.shape),
            const2d(w3.shape), const2d(b3.shape),
        ],
        out_specs=pl.BlockSpec((tb, OUT_PAD), lambda i: (i, 0)),
        compiler_params=pltpu.CompilerParams(
            dimension_semantics=("parallel",)),
        cost_estimate=cost,
    )(x, w1, b1, w2, b2, w3, b3)
    return out[:B, :OUT]


def init_params(key):
    """Deterministic init matching nn.Linear shapes (PyTorch-style uniform).

    Weights stored [in, out] so the kernel computes x @ W + b (== x @ W.T
    with PyTorch's [out, in] weight)."""
    ks = jax.random.split(key, 6)

    def linear(kw, kb, fan_in, fan_out):
        bound = 1.0 / (fan_in ** 0.5)
        w = jax.random.uniform(kw, (fan_in, fan_out), jnp.float32, -bound, bound)
        b = jax.random.uniform(kb, (1, fan_out), jnp.float32, -bound, bound)
        return w, b

    w1, b1 = linear(ks[0], ks[1], 1, H1)
    w2, b2 = linear(ks[2], ks[3], H1, H2)
    w3, b3 = linear(ks[4], ks[5], H2, OUT)
    return dict(w1=w1, b1=b1, w2=w2, b2=b2, w3=w3, b3=b3)


def reference_forward(x, p):
    h1 = jnp.tanh(x @ p["w1"] + p["b1"])
    h2 = jnp.tanh(h1 @ p["w2"] + p["b2"])
    return h2 @ p["w3"] + p["b3"]


if __name__ == "__main__":
    key = jax.random.PRNGKey(0)
    k_params, k_x = jax.random.split(key)
    params = init_params(k_params)

    B = 10  # small, non-multiple-of-8 batch exercises wrapper pad + slice
    x = jax.random.normal(k_x, (B, 1), jnp.float32)

    out = jax.block_until_ready(bridge_dqn_forward(x, params))
    ref = reference_forward(x, params)

    assert out.shape == (B, OUT)
    assert jnp.allclose(out, ref, atol=1e-4, rtol=1e-4), float(
        jnp.max(jnp.abs(out - ref)))

    print("KERNEL_OK")
</pallas_src>

<mosaic_0001>
module attributes {stable_mosaic.version = 11 : i64} {
  func.func @bridge_dqn_kernel(%arg0: i32, %arg1: memref<16x1xf32, #tpu.memory_space<vmem>>, %arg2: memref<1x128xf32, #tpu.memory_space<vmem>>, %arg3: memref<1x128xf32, #tpu.memory_space<vmem>>, %arg4: memref<128x128xf32, #tpu.memory_space<vmem>>, %arg5: memref<1x128xf32, #tpu.memory_space<vmem>>, %arg6: memref<128x128xf32, #tpu.memory_space<vmem>>, %arg7: memref<1x128xf32, #tpu.memory_space<vmem>>, %arg8: memref<16x128xf32, #tpu.memory_space<vmem>>) attributes {dimension_semantics = [#tpu.dimension_semantics<parallel>], iteration_bounds = array<i64: 1>, scalar_prefetch = 0 : i64, scratch_operands = 0 : i64, tpu.core_type = #tpu.core_type<tc>, window_params = [{transform_indices = @transform_0, window_bounds = array<i64: 16, 1>}, {pipeline_mode = #tpu.pipeline_mode<synchronous>, transform_indices = @transform_1, window_bounds = array<i64: 1, 128>}, {pipeline_mode = #tpu.pipeline_mode<synchronous>, transform_indices = @transform_2, window_bounds = array<i64: 1, 128>}, {pipeline_mode = #tpu.pipeline_mode<synchronous>, transform_indices = @transform_3, window_bounds = array<i64: 128, 128>}, {pipeline_mode = #tpu.pipeline_mode<synchronous>, transform_indices = @transform_4, window_bounds = array<i64: 1, 128>}, {pipeline_mode = #tpu.pipeline_mode<synchronous>, transform_indices = @transform_5, window_bounds = array<i64: 128, 128>}, {pipeline_mode = #tpu.pipeline_mode<synchronous>, transform_indices = @transform_6, window_bounds = array<i64: 1, 128>}, {transform_indices = @transform_7, window_bounds = array<i64: 16, 128>}]} {
    %c0 = arith.constant 0 : index
    %c0_0 = arith.constant 0 : index
    %0 = vector.load %arg1[%c0, %c0_0] : memref<16x1xf32, #tpu.memory_space<vmem>>, vector<16x1xf32>
    %c0_1 = arith.constant 0 : index
    %c0_2 = arith.constant 0 : index
    %1 = vector.load %arg2[%c0_1, %c0_2] : memref<1x128xf32, #tpu.memory_space<vmem>>, vector<1x128xf32>
    %2 = vector.broadcast %0 : vector<16x1xf32> to vector<16x128xf32>
    %3 = vector.broadcast %1 : vector<1x128xf32> to vector<16x128xf32>
    %4 = arith.mulf %2, %3 : vector<16x128xf32>
    %c0_3 = arith.constant 0 : index
    %c0_4 = arith.constant 0 : index
    %5 = vector.load %arg3[%c0_3, %c0_4] : memref<1x128xf32, #tpu.memory_space<vmem>>, vector<1x128xf32>
    %6 = vector.broadcast %5 : vector<1x128xf32> to vector<16x128xf32>
    %7 = arith.addf %4, %6 : vector<16x128xf32>
    %8 = math.tanh %7 : vector<16x128xf32>
    %c0_5 = arith.constant 0 : index
    %c0_6 = arith.constant 0 : index
    %9 = vector.load %arg4[%c0_5, %c0_6] : memref<128x128xf32, #tpu.memory_space<vmem>>, vector<128x128xf32>
    %cst = arith.constant dense<0.000000e+00> : vector<16x128xf32>
    %10 = tpu.matmul %8, %9, %cst {dimension_numbers = #tpu.dot_dimension_numbers<[1], [0], [0], [1], [0, 0, 1, 1], [], []>} : vector<16x128xf32>, vector<128x128xf32>, vector<16x128xf32> -> vector<16x128xf32>
    %c0_7 = arith.constant 0 : index
    %c0_8 = arith.constant 0 : index
    %11 = vector.load %arg5[%c0_7, %c0_8] : memref<1x128xf32, #tpu.memory_space<vmem>>, vector<1x128xf32>
    %12 = vector.broadcast %11 : vector<1x128xf32> to vector<16x128xf32>
    %13 = arith.addf %10, %12 : vector<16x128xf32>
    %14 = math.tanh %13 : vector<16x128xf32>
    %c0_9 = arith.constant 0 : index
    %c0_10 = arith.constant 0 : index
    %15 = vector.load %arg6[%c0_9, %c0_10] : memref<128x128xf32, #tpu.memory_space<vmem>>, vector<128x128xf32>
    %cst_11 = arith.constant dense<0.000000e+00> : vector<16x128xf32>
    %16 = tpu.matmul %14, %15, %cst_11 {dimension_numbers = #tpu.dot_dimension_numbers<[1], [0], [0], [1], [0, 0, 1, 1], [], []>} : vector<16x128xf32>, vector<128x128xf32>, vector<16x128xf32> -> vector<16x128xf32>
    %c0_12 = arith.constant 0 : index
    %c0_13 = arith.constant 0 : index
    %17 = vector.load %arg7[%c0_12, %c0_13] : memref<1x128xf32, #tpu.memory_space<vmem>>, vector<1x128xf32>
    %18 = vector.broadcast %17 : vector<1x128xf32> to vector<16x128xf32>
    %19 = arith.addf %16, %18 : vector<16x128xf32>
    %c0_14 = arith.constant 0 : index
    %c0_15 = arith.constant 0 : index
    %20 = vector.load %arg8[%c0_14, %c0_15] : memref<16x128xf32, #tpu.memory_space<vmem>>, vector<16x128xf32>
    tpu.vector_store %arg8[%c0_14, %c0_15], %19 {strides = array<i32>} : memref<16x128xf32, #tpu.memory_space<vmem>>, vector<16x128xf32>,
    return
  }
  func.func @transform_0(%arg0: i32) -> (i32, i32) {
    %c0_i32 = arith.constant 0 : i32
    %c0_i32_0 = arith.constant 0 : i32
    return %arg0, %c0_i32 : i32, i32
  }
  func.func @transform_1(%arg0: i32) -> (i32, i32) {
    %c0_i32 = arith.constant 0 : i32
    %c0_i32_0 = arith.constant 0 : i32
    %c0_i32_1 = arith.constant 0 : i32
    return %c0_i32, %c0_i32_0 : i32, i32
  }
  func.func @transform_2(%arg0: i32) -> (i32, i32) {
    %c0_i32 = arith.constant 0 : i32
    %c0_i32_0 = arith.constant 0 : i32
    %c0_i32_1 = arith.constant 0 : i32
    return %c0_i32, %c0_i32_0 : i32, i32
  }
  func.func @transform_3(%arg0: i32) -> (i32, i32) {
    %c0_i32 = arith.constant 0 : i32
    %c0_i32_0 = arith.constant 0 : i32
    %c0_i32_1 = arith.constant 0 : i32
    return %c0_i32, %c0_i32_0 : i32, i32
  }
  func.func @transform_4(%arg0: i32) -> (i32, i32) {
    %c0_i32 = arith.constant 0 : i32
    %c0_i32_0 = arith.constant 0 : i32
    %c0_i32_1 = arith.constant 0 : i32
    return %c0_i32, %c0_i32_0 : i32, i32
  }
  func.func @transform_5(%arg0: i32) -> (i32, i32) {
    %c0_i32 = arith.constant 0 : i32
    %c0_i32_0 = arith.constant 0 : i32
    %c0_i32_1 = arith.constant 0 : i32
    return %c0_i32, %c0_i32_0 : i32, i32
  }
  func.func @transform_6(%arg0: i32) -> (i32, i32) {
    %c0_i32 = arith.constant 0 : i32
    %c0_i32_0 = arith.constant 0 : i32
    %c0_i32_1 = arith.constant 0 : i32
    return %c0_i32, %c0_i32_0 : i32, i32
  }
  func.func @transform_7(%arg0: i32) -> (i32, i32) {
    %c0_i32 = arith.constant 0 : i32
    %c0_i32_0 = arith.constant 0 : i32
    return %arg0, %c0_i32 : i32, i32
  }
}

</mosaic_0001>

<bundles_post_ra>
// kernel: bridge_dqn_forward.1
= control target key start
LH: loop header
LB: loop body
LE: loop exit
PB: predicated region body
PF: predicated region fallthrough
CT: control target
= control target key end

     0   :  { %v192_v0 = vmov 0   ;;  %s353_s0 = inlined_call_operand.vmem [shape: f32[16,1], index: 0, kind: input, shape index: {}]   ;;  %s354_s3 = inlined_call_operand.vmem [shape: f32[128,128], index: 3, kind: input, shape index: {}]   ;;  %s355_s1 = inlined_call_operand.vmem [shape: f32[1,128], index: 1, kind: input, shape index: {}]   ;;  %s356_s2 = inlined_call_operand.vmem [shape: f32[1,128], index: 2, kind: input, shape index: {}]   ;;  %s357_s4 = inlined_call_operand.vmem [shape: f32[1,128], index: 4, kind: input, shape index: {}]   ;;  %s358_s5 = inlined_call_operand.vmem [shape: f32[128,128], index: 5, kind: input, shape index: {}]   ;;  %s359_s6 = inlined_call_operand.vmem [shape: f32[1,128], index: 6, kind: input, shape index: {}]   ;;  %s360_s7 = inlined_call_operand.vmem [shape: f32[16,128], index: 7, kind: output, shape index: {}]  }
   0x1   :  { %179 = vset.pattern.permute.xlu0 %v192_v0  ;;  %v27_v1 = vld [vmem:[%s353_s0 + $0x8] sm:$0xff]  ;;  %v67_v2 = vld [vmem:[%s354_s3 + $0x78] sm:$0xff]  ;;  %v66_v3 = vld [vmem:[%s354_s3 + $0x70] sm:$0xff] }
   0x2   :  { %36 = vperm.xlu0 %179, %v27_v1   ;;  %146 = vmatpush.msra.mxu2 %v67_v2  ;;  %v65_v4 = vld [vmem:[%s354_s3 + $0x68] sm:$0xff]  ;;  %v64_v5 = vld [vmem:[%s354_s3 + $0x60] sm:$0xff]  ;;  %v63_v7 = vld [vmem:[%s354_s3 + $0x58] sm:$0xff] }
   0x3   :  { %72 = vmatpush.msra.mxu0 %v67_v2  ;;  %v26_v6 = vld [vmem:[%s353_s0] sm:$0xff]  ;;  %v62_v8 = vld [vmem:[%s354_s3 + $0x50] sm:$0xff]  ;;  %v61_v9 = vld [vmem:[%s354_s3 + $0x48] sm:$0xff] }
   0x4   :  { %147 = vmatpush.msra.mxu2 %v66_v3  ;;  %v60_v10 = vld [vmem:[%s354_s3 + $0x40] sm:$0xff]  ;;  %v59_v11 = vld [vmem:[%s354_s3 + $0x38] sm:$0xff]  ;;  %v58_v12 = vld [vmem:[%s354_s3 + $0x30] sm:$0xff] }
   0x5   :  { %73 = vmatpush.msra.mxu0 %v66_v3  ;;  %v57_v13 = vld [vmem:[%s354_s3 + $0x28] sm:$0xff]  ;;  %v56_v14 = vld [vmem:[%s354_s3 + $0x20] sm:$0xff]  ;;  %v55_v15 = vld [vmem:[%s354_s3 + $0x18] sm:$0xff] }
   0x6   :  { %148 = vmatpush.msra.mxu2 %v65_v4  ;;  %v54_v16 = vld [vmem:[%s354_s3 + $0x10] sm:$0xff]  ;;  %v53_v17 = vld [vmem:[%s354_s3 + $0x8] sm:$0xff]  ;;  %v52_v18 = vld [vmem:[%s354_s3] sm:$0xff] }
   0x7   :  { %74 = vmatpush.msra.mxu0 %v65_v4  ;;  %v112_v19 = vld [vmem:[%s358_s5 + $0x78] sm:$0xff]  ;;  %v111_v20 = vld [vmem:[%s358_s5 + $0x70] sm:$0xff]  ;;  %v110_v21 = vld [vmem:[%s358_s5 + $0x68] sm:$0xff] }
   0x8   :  { %149 = vmatpush.msra.mxu2 %v64_v5  ;;  %162 = vmatpush.msra.mxu3 %v112_v19  ;;  %v109_v22 = vld [vmem:[%s358_s5 + $0x60] sm:$0xff]  ;;  %v108_v23 = vld [vmem:[%s358_s5 + $0x58] sm:$0xff]  ;;  %v107_v24 = vld [vmem:[%s358_s5 + $0x50] sm:$0xff] }
   0x9   :  { %75 = vmatpush.msra.mxu0 %v64_v5  ;;  %117 = vmatpush.msra.mxu1 %v112_v19  ;;  %v180_v25 = vld [vmem:[%s355_s1] ss:$0 sm:$0xff]  ;;  %v106_v26 = vld [vmem:[%s358_s5 + $0x48] sm:$0xff]  ;;  %v104_v31 = vld [vmem:[%s358_s5 + $0x38] sm:$0xff] }
   0xa   :  { %31 = vperm.xlu0 %179, %v26_v6   ;;  %150 = vmatpush.msra.mxu2 %v63_v7  ;;  %v181_v27 = vld [vmem:[%s356_s2] ss:$0 sm:$0xff]  ;;  %v103_v33 = vld [vmem:[%s358_s5 + $0x30] sm:$0xff]  ;;  %v102_v34 = vld [vmem:[%s358_s5 + $0x28] sm:$0xff] }
   0xb   :  { %76 = vmatpush.msra.mxu0 %v63_v7  ;;  %163 = vmatpush.msra.mxu3 %v111_v20  ;;  %v105_v29 = vld [vmem:[%s358_s5 + $0x40] sm:$0xff]  ;;  %v100_v41 = vld [vmem:[%s358_s5 + $0x18] sm:$0xff]  ;;  %v99_v42 = vld [vmem:[%s358_s5 + $0x10] sm:$0xff] }
   0xc   :  { %151 = vmatpush.msra.mxu2 %v62_v8  ;;  %118 = vmatpush.msra.mxu1 %v111_v20  ;;  %v101_v40 = vld [vmem:[%s358_s5 + $0x20] sm:$0xff]  ;;  %v98_v43 = vld [vmem:[%s358_s5 + $0x8] sm:$0xff] }
   0xd   :  { %77 = vmatpush.msra.mxu0 %v62_v8  ;;  %164 = vmatpush.msra.mxu3 %v110_v21  ;;  %v97_v44 = vld [vmem:[%s358_s5] sm:$0xff] }
   0xe   :  { %152 = vmatpush.msra.mxu2 %v61_v9  ;;  %119 = vmatpush.msra.mxu1 %v110_v21  ;;  %v182_v45 = vld [vmem:[%s357_s4] ss:$0 sm:$0xff] }
   0xf   :  { %78 = vmatpush.msra.mxu0 %v61_v9  ;;  %165 = vmatpush.msra.mxu3 %v109_v22  ;;  %v183_v52 = vld [vmem:[%s359_s6] ss:$0 sm:$0xff] }
  0x10   :  { %153 = vmatpush.msra.mxu2 %v60_v10  ;;  %120 = vmatpush.msra.mxu1 %v109_v22 }
  0x11   :  { %79 = vmatpush.msra.mxu0 %v60_v10  ;;  %166 = vmatpush.msra.mxu3 %v108_v23 }
  0x12   :  { %154 = vmatpush.msra.mxu2 %v59_v11  ;;  %121 = vmatpush.msra.mxu1 %v108_v23 }
  0x13   :  { %80 = vmatpush.msra.mxu0 %v59_v11  ;;  %167 = vmatpush.msra.mxu3 %v107_v24 }
  0x14   :  { %155 = vmatpush.msra.mxu2 %v58_v12  ;;  %122 = vmatpush.msra.mxu1 %v107_v24 }
  0x15   :  { %81 = vmatpush.msra.mxu0 %v58_v12  ;;  %168 = vmatpush.msra.mxu3 %v106_v26 }
  0x16   :  { %156 = vmatpush.msra.mxu2 %v57_v13  ;;  %123 = vmatpush.msra.mxu1 %v106_v26 }
  0x17   :  { %82 = vmatpush.msra.mxu0 %v57_v13  ;;  %169 = vmatpush.msra.mxu3 %v105_v29 }
  0x18   :  { %157 = vmatpush.msra.mxu2 %v56_v14  ;;  %124 = vmatpush.msra.mxu1 %v105_v29 }
  0x19   :  { %83 = vmatpush.msra.mxu0 %v56_v14  ;;  %170 = vmatpush.msra.mxu3 %v104_v31 }
  0x1a   :  { %158 = vmatpush.msra.mxu2 %v55_v15  ;;  %125 = vmatpush.msra.mxu1 %v104_v31 }
  0x1b   :  { %84 = vmatpush.msra.mxu0 %v55_v15  ;;  %171 = vmatpush.msra.mxu3 %v103_v33 }
  0x1c   :  { %159 = vmatpush.msra.mxu2 %v54_v16  ;;  %126 = vmatpush.msra.mxu1 %v103_v33 }
  0x1d   :  { %85 = vmatpush.msra.mxu0 %v54_v16  ;;  %172 = vmatpush.msra.mxu3 %v102_v34 }
  0x1e   :  { %160 = vmatpush.msra.mxu2 %v53_v17  ;;  %127 = vmatpush.msra.mxu1 %v102_v34 }
  0x1f   :  { %86 = vmatpush.msra.mxu0 %v53_v17  ;;  %173 = vmatpush.msra.mxu3 %v101_v40 }
  0x20   :  { %161 = vmatpush.msra.mxu2 %v52_v18  ;;  %128 = vmatpush.msra.mxu1 %v101_v40 }
  0x21   :  { %87 = vmatpush.msra.mxu0 %v52_v18  ;;  %174 = vmatpush.msra.mxu3 %v100_v41 }
  0x22   :  { %129 = vmatpush.msra.mxu1 %v100_v41 }
  0x23   :  { %175 = vmatpush.msra.mxu3 %v99_v42 }
  0x24   :  { %130 = vmatpush.msra.mxu1 %v99_v42 }
  0x25   :  { %176 = vmatpush.msra.mxu3 %v98_v43 }
  0x26   :  { %131 = vmatpush.msra.mxu1 %v98_v43 }
  0x27   :  { %177 = vmatpush.msra.mxu3 %v97_v44 }
  0x28   :  { %132 = vmatpush.msra.mxu1 %v97_v44 }
  0x74   :  { %v37_v28 = vpop.permute.xlu0 %36 }
  0x75   :  { %v43_v30 = vmul.f32 %v180_v25, %v37_v28 }
  0x77   :  { %v49_v32 = vadd.f32 %v181_v27, %v43_v30 }
  0x79   :  { %184 = vtanh.f32 %v49_v32 }
  0x7c   :  { %v32_v35 = vpop.permute.xlu0 %31 }
  0x7d   :  { %v42_v36 = vmul.f32 %v180_v25, %v32_v35 }
  0x7f   :  { %v185_v37 = vpop.eup %184  ;;  %v48_v38 = vadd.f32 %v181_v27, %v42_v36 }
  0x80   :  { %91 = vmatmul.f32.vlgmr.msra.gmra.mxu2 %v185_v37 }
  0x81   :  { %186 = vtanh.f32 %v48_v38 }
  0x87   :  { %v187_v39 = vpop.eup %186 }
  0x88   :  { %88 = vmatmul.f32.vlgmr.msra.gmra.mxu0 %v187_v39 }
 0x103   :  { %v92_v46 = vpop.f32.mrf.mxu2 }
 0x104   :  { %v93_v47 = vadd.f32 %v182_v45, %v92_v46 }
 0x105   :  { %v89_v48 = vpop.f32.mrf.mxu0 }
 0x106   :  { %188 = vtanh.f32 %v93_v47  ;;  %v90_v49 = vadd.f32 %v182_v45, %v89_v48 }
 0x108   :  { %190 = vtanh.f32 %v90_v49 }
 0x10c   :  { %v189_v50 = vpop.eup %188 }
 0x10d   :  { %136 = vmatmul.f32.vlgmr.msra.gmra.mxu3 %v189_v50 }
 0x10e   :  { %v191_v51 = vpop.eup %190 }
 0x10f   :  { %133 = vmatmul.f32.vlgmr.msra.gmra.mxu1 %v191_v51 }
 0x18c   :  { %v134_v53 = vpop.f32.mrf.mxu1 }
 0x18d   :  { %v135_v54 = vadd.f32 %v183_v52, %v134_v53 }
 0x18f   :  { %140 = vst [vmem:[%s360_s7] sm:$0xff] %v135_v54 }
 0x190   :  { %v137_v55 = vpop.f32.mrf.mxu3 }
 0x191   :  { %v138_v56 = vadd.f32 %v183_v52, %v137_v55 }
 0x193   :  { %141 = vst [vmem:[%s360_s7 + $0x8] sm:$0xff] %v138_v56 }

</bundles_post_ra>
